<compile_context>
chip_gen: v6e
topology: v6e:2x2x1
jax: 0.10.0
libtpu: 0.0.40
codegen_flags: <defaults>
</compile_context>

<pallas_src>
import math
import jax
import jax.numpy as jnp
from jax.experimental import pallas as pl
from jax.experimental.pallas import tpu as pltpu

# ---------------- configuration (small synthetic shapes) ----------------
B = 2          # batch
N_W = 8        # sequence length (n_w)
C = 32         # hidden_dim == out_dim
N_HEADS = 4    # attention heads
D_HEAD = C // N_HEADS
LN_EPS = 1e-5
NEG_INF = -1e30

LANES = 128
assert 4 * C == LANES, "packed activation slab layout assumes 4*C == 128"
assert (B * N_W * C) % LANES == 0, "lane-dense output layout assumes divisibility"
NQ = B * N_W                          # 16 (b, w) rows
OUT_ROWS = (B * N_W * C) // LANES     # 4
ROWS_PER_OUT = LANES // C             # 4 y-rows per dense 128-lane output row

# packed weight / param / bias slab row layout (all f32, 128 lanes wide)
PRM_ROW = C                           # rows 32..37: bq, bk, bv, bo, gamma, beta
BIAS_ROW = C + 8                      # rows 40..103: key-padding bias block
BIAS_ROWS = N_HEADS * B * N_W         # 64 rows: (head, batch, query) x key-lanes
SLAB_ROWS = BIAS_ROW + BIAS_ROWS      # 104


def ddi_kernel(act_ref, wp_ref, out_ref):
    act = act_ref[...]                          # (B, N_W, 4*C) = (2, 8, 128)
    x3 = act[:, :, 0:C]                         # x
    pe3 = act[:, :, C:2 * C]                    # positional embedding
    ga3 = act[:, :, 2 * C:3 * C]                # graph-attention output (padded)

    x2 = x3.reshape(NQ, C)                      # leading-dim collapse (layout no-op)
    qkin2 = (x3 + pe3).reshape(NQ, C)           # with_pos_embed
    ga2 = ga3.reshape(NQ, C)

    wp = wp_ref[...]                            # (104, 128)
    w_qk_t = wp[0:C, 0:2 * C]                   # [Wq^T | Wk^T]  (C, 2C)
    w_v_t = wp[0:C, 2 * C:3 * C]                # Wv^T           (C, C)
    w_o_t = wp[0:C, 3 * C:4 * C]                # Wo^T           (C, C)
    bq = wp[PRM_ROW + 0:PRM_ROW + 1, 0:C]
    bk = wp[PRM_ROW + 1:PRM_ROW + 2, 0:C]
    bv = wp[PRM_ROW + 2:PRM_ROW + 3, 0:C]
    bo = wp[PRM_ROW + 3:PRM_ROW + 4, 0:C]
    gamma = wp[PRM_ROW + 4:PRM_ROW + 5, 0:C]
    beta = wp[PRM_ROW + 5:PRM_ROW + 6, 0:C]
    # additive key-padding bias, already broadcast to (head*batch, q, k)
    bias3 = wp[BIAS_ROW:BIAS_ROW + BIAS_ROWS, 0:N_W].reshape(
        N_HEADS * B, N_W, N_W)

    # ---- projections: two MXU dots (shared LHS for Q/K), no LHS concat ----
    qk = jnp.dot(qkin2, w_qk_t, preferred_element_type=jnp.float32)   # (NQ, 2C)
    q2 = qk[:, 0:C] + bq
    k2 = qk[:, C:2 * C] + bk
    v2 = jnp.dot(x2, w_v_t, preferred_element_type=jnp.float32) + bv  # (NQ, C)

    scale = 1.0 / math.sqrt(D_HEAD)

    def fold(t2):
        # (NQ, C) -> (N_HEADS*B, N_W, D_HEAD), head-major on the leading dim.
        return jnp.concatenate(
            [t2[:, h * D_HEAD:(h + 1) * D_HEAD].reshape(B, N_W, D_HEAD)
             for h in range(N_HEADS)], axis=0)

    qf = fold(q2) * scale
    kf = fold(k2)
    vf = fold(v2)

    # ---- one batched score matmul + ONE softmax over all (head, batch) ----
    s = jnp.einsum('bqd,bkd->bqk', qf, kf,
                   preferred_element_type=jnp.float32) + bias3
    s = s - jnp.max(s, axis=-1, keepdims=True)
    p = jnp.exp(s)
    p = p * pl.reciprocal(jnp.sum(p, axis=-1, keepdims=True), approx=True)
    o = jnp.einsum('bqk,bkd->bqd', p, vf,
                   preferred_element_type=jnp.float32)                # (HB, N_W, D)

    # heads back to the channel dim (head-major), then output projection
    attn2 = jnp.concatenate(
        [o[h * B:(h + 1) * B].reshape(NQ, D_HEAD) for h in range(N_HEADS)],
        axis=-1)                                                      # (NQ, C)
    sa2 = jnp.dot(attn2, w_o_t, preferred_element_type=jnp.float32) + bo

    # dropout(p=0) is identity:  y = sa_output + ga_output + x ; then LayerNorm
    y = sa2 + ga2 + x2
    mu = jnp.mean(y, axis=-1, keepdims=True)
    var = jnp.mean(jnp.square(y - mu), axis=-1, keepdims=True)
    yn = (y - mu) * jax.lax.rsqrt(var + LN_EPS) * gamma + beta        # (NQ, C)

    # ---- lane-dense store: assemble (OUT_ROWS, 128) rows by lane concat ----
    out_rows = []
    for r in range(OUT_ROWS):
        out_rows.append(jnp.concatenate(
            [yn[r * ROWS_PER_OUT + j:r * ROWS_PER_OUT + j + 1, :]
             for j in range(ROWS_PER_OUT)], axis=-1))                 # (1, 128)
    out_ref[...] = jnp.concatenate(out_rows, axis=0).astype(out_ref.dtype)


@jax.jit
def ddi_forward(x, x_mask, pe, ga_padded, wqkv, bqkv, wo, bo, gamma, beta):
    # ---- host-side layout prep: exactly two dense (8,128)-tiled operands ----
    # activation slab: [x | pe | ga | zeros] along channels -> (B, N_W, 128)
    act = jnp.concatenate([x, pe, ga_padded, jnp.zeros_like(x)], axis=-1)

    # weight/param slab (SLAB_ROWS, 128):
    #   rows 0:C          [ wqkv^T | wo^T ]           (dense 128 lanes)
    #   rows C:C+6        bq, bk, bv, bo, gamma, beta (lanes 0:C)
    #   rows BIAS_ROW:+64 key-padding bias, pre-broadcast over (head, batch, q)
    w_top = jnp.concatenate([wqkv.T, wo.T], axis=1)                    # (C, 128)
    prm = jnp.concatenate([bqkv.reshape(3, C), bo.reshape(1, C),
                           gamma.reshape(1, C), beta.reshape(1, C)], axis=0)
    prm = jnp.pad(prm, ((0, 8 - 6), (0, LANES - C)))                   # (8, 128)
    kb = jnp.where(x_mask, jnp.float32(NEG_INF), jnp.float32(0.0))     # (B, N_W)
    kb_blk = jnp.broadcast_to(kb[None, :, None, :],
                              (N_HEADS, B, N_W, N_W)).reshape(BIAS_ROWS, N_W)
    kb_blk = jnp.pad(kb_blk, ((0, 0), (0, LANES - N_W)))               # (64, 128)
    wp = jnp.concatenate([w_top, prm, kb_blk], axis=0)                 # (104, 128)

    vmem = pl.BlockSpec(memory_space=pltpu.MemorySpace.VMEM)
    out = pl.pallas_call(
        ddi_kernel,
        out_shape=jax.ShapeDtypeStruct((OUT_ROWS, LANES), jnp.float32),
        in_specs=[vmem, vmem],
        out_specs=vmem,
    )(act, wp)
    return out.reshape(B, N_W, C)


def ddi_reference(x, x_mask, pe, ga_padded, wqkv, bqkv, wo, bo, gamma, beta):
    """Pure-JAX reference mirroring PyTorch nn.MultiheadAttention + LayerNorm."""
    qk_in = x + pe
    q = qk_in @ wqkv[0:C].T + bqkv[0:C]
    k = qk_in @ wqkv[C:2 * C].T + bqkv[C:2 * C]
    v = x @ wqkv[2 * C:].T + bqkv[2 * C:]
    qh = q.reshape(B, N_W, N_HEADS, D_HEAD).transpose(0, 2, 1, 3)
    kh = k.reshape(B, N_W, N_HEADS, D_HEAD).transpose(0, 2, 1, 3)
    vh = v.reshape(B, N_W, N_HEADS, D_HEAD).transpose(0, 2, 1, 3)
    s = jnp.einsum('bhqd,bhkd->bhqk', qh, kh) / math.sqrt(D_HEAD)
    s = jnp.where(x_mask[:, None, None, :], NEG_INF, s)
    p = jax.nn.softmax(s, axis=-1)
    o = jnp.einsum('bhqk,bhkd->bhqd', p, vh).transpose(0, 2, 1, 3).reshape(B, N_W, C)
    sa = o @ wo.T + bo
    y = sa + ga_padded + x
    mu = y.mean(-1, keepdims=True)
    var = ((y - mu) ** 2).mean(-1, keepdims=True)
    return (y - mu) / jnp.sqrt(var + LN_EPS) * gamma + beta


def get_batches_pad(batch_x_flat, batch_offsets, max_len):
    """JAX glue reproducing DDI.get_batches + zero-pad-to-n_w (graph2batch)."""
    Bn = len(batch_offsets) - 1
    ga = jnp.zeros((Bn, max_len, batch_x_flat.shape[1]), jnp.float32)
    for i in range(Bn):
        s, e = int(batch_offsets[i]), int(batch_offsets[i + 1])
        ga = ga.at[i, :e - s, :].set(batch_x_flat[s:e])
    return ga


if __name__ == "__main__":
    key = jax.random.PRNGKey(0)
    ks = jax.random.split(key, 8)

    # inputs
    x = jax.random.normal(ks[0], (B, N_W, C), jnp.float32)
    pe = jax.random.normal(ks[1], (B, N_W, C), jnp.float32) * 0.1
    # key-padding mask: batch 0 has no padding, batch 1 has last 3 tokens padded
    x_mask = jnp.array(
        [[False] * N_W,
         [False] * (N_W - 3) + [True] * 3], dtype=bool)

    # synthetic graph node features (flat, as in a batched DGL graph)
    batch_offsets = [0, 5, 11]                       # 5 and 6 nodes per graph
    batch_x_flat = jax.random.normal(ks[2], (batch_offsets[-1], C), jnp.float32)
    # TODO(synk): graph_attn (GraphTransformerSubLayer) not applied — features pass through.
    ga_padded = get_batches_pad(batch_x_flat, batch_offsets, N_W)

    # deterministic parameter init (nn.MultiheadAttention + nn.LayerNorm shapes)
    wqkv = jax.random.normal(ks[3], (3 * C, C), jnp.float32) * (1.0 / math.sqrt(C))
    bqkv = jnp.zeros((3 * C,), jnp.float32)
    wo = jax.random.normal(ks[4], (C, C), jnp.float32) * (1.0 / math.sqrt(C))
    bo = jnp.zeros((C,), jnp.float32)
    gamma = jnp.ones((C,), jnp.float32)
    beta = jnp.zeros((C,), jnp.float32)

    out = ddi_forward(x, x_mask, pe, ga_padded, wqkv, bqkv, wo, bo, gamma, beta)
    out = jax.block_until_ready(out)
    assert out.shape == (B, N_W, C)
    assert bool(jnp.all(jnp.isfinite(out)))

    ref = ddi_reference(x, x_mask, pe, ga_padded, wqkv, bqkv, wo, bo, gamma, beta)
    err = float(jnp.max(jnp.abs(out - ref)))
    assert err < 5e-2, f"mismatch vs pure-JAX reference: {err}"
    print("KERNEL_OK")
</pallas_src>

<mosaic_0001>
module attributes {stable_mosaic.version = 11 : i64} {
  func.func @ddi_kernel(%arg0: memref<2x8x128xf32, #tpu.memory_space<vmem>>, %arg1: memref<104x128xf32, #tpu.memory_space<vmem>>, %arg2: memref<4x128xf32, #tpu.memory_space<vmem>>) attributes {dimension_semantics = [], scalar_prefetch = 0 : i64, scratch_operands = 0 : i64, tpu.core_type = #tpu.core_type<tc>} {
    %c0 = arith.constant 0 : index
    %c0_0 = arith.constant 0 : index
    %c0_1 = arith.constant 0 : index
    %0 = vector.load %arg0[%c0, %c0_0, %c0_1] : memref<2x8x128xf32, #tpu.memory_space<vmem>>, vector<2x8x128xf32>
    %1 = vector.extract_strided_slice %0 {offsets = [0, 0, 0], sizes = [2, 8, 32], strides = [1, 1, 1]} : vector<2x8x128xf32> to vector<2x8x32xf32>
    %2 = vector.extract_strided_slice %0 {offsets = [0, 0, 32], sizes = [2, 8, 32], strides = [1, 1, 1]} : vector<2x8x128xf32> to vector<2x8x32xf32>
    %3 = vector.extract_strided_slice %0 {offsets = [0, 0, 64], sizes = [2, 8, 32], strides = [1, 1, 1]} : vector<2x8x128xf32> to vector<2x8x32xf32>
    %4 = vector.shape_cast %1 : vector<2x8x32xf32> to vector<16x32xf32>
    %5 = arith.addf %1, %2 : vector<2x8x32xf32>
    %6 = vector.shape_cast %5 : vector<2x8x32xf32> to vector<16x32xf32>
    %7 = vector.shape_cast %3 : vector<2x8x32xf32> to vector<16x32xf32>
    %c0_2 = arith.constant 0 : index
    %c0_3 = arith.constant 0 : index
    %8 = vector.load %arg1[%c0_2, %c0_3] : memref<104x128xf32, #tpu.memory_space<vmem>>, vector<104x128xf32>
    %9 = vector.extract_strided_slice %8 {offsets = [0, 0], sizes = [32, 64], strides = [1, 1]} : vector<104x128xf32> to vector<32x64xf32>
    %10 = vector.extract_strided_slice %8 {offsets = [0, 64], sizes = [32, 32], strides = [1, 1]} : vector<104x128xf32> to vector<32x32xf32>
    %11 = vector.extract_strided_slice %8 {offsets = [0, 96], sizes = [32, 32], strides = [1, 1]} : vector<104x128xf32> to vector<32x32xf32>
    %12 = vector.extract_strided_slice %8 {offsets = [32, 0], sizes = [1, 32], strides = [1, 1]} : vector<104x128xf32> to vector<1x32xf32>
    %13 = vector.extract_strided_slice %8 {offsets = [33, 0], sizes = [1, 32], strides = [1, 1]} : vector<104x128xf32> to vector<1x32xf32>
    %14 = vector.extract_strided_slice %8 {offsets = [34, 0], sizes = [1, 32], strides = [1, 1]} : vector<104x128xf32> to vector<1x32xf32>
    %15 = vector.extract_strided_slice %8 {offsets = [35, 0], sizes = [1, 32], strides = [1, 1]} : vector<104x128xf32> to vector<1x32xf32>
    %16 = vector.extract_strided_slice %8 {offsets = [36, 0], sizes = [1, 32], strides = [1, 1]} : vector<104x128xf32> to vector<1x32xf32>
    %17 = vector.extract_strided_slice %8 {offsets = [37, 0], sizes = [1, 32], strides = [1, 1]} : vector<104x128xf32> to vector<1x32xf32>
    %18 = vector.extract_strided_slice %8 {offsets = [40, 0], sizes = [64, 8], strides = [1, 1]} : vector<104x128xf32> to vector<64x8xf32>
    %19 = vector.shape_cast %18 : vector<64x8xf32> to vector<8x8x8xf32>
    %cst = arith.constant dense<0.000000e+00> : vector<16x64xf32>
    %20 = tpu.matmul %6, %9, %cst {dimension_numbers = #tpu.dot_dimension_numbers<[1], [0], [0], [1], [0, 0, 1, 1], [], []>} : vector<16x32xf32>, vector<32x64xf32>, vector<16x64xf32> -> vector<16x64xf32>
    %21 = vector.extract_strided_slice %20 {offsets = [0, 0], sizes = [16, 32], strides = [1, 1]} : vector<16x64xf32> to vector<16x32xf32>
    %22 = vector.broadcast %12 : vector<1x32xf32> to vector<16x32xf32>
    %23 = arith.addf %21, %22 : vector<16x32xf32>
    %24 = vector.extract_strided_slice %20 {offsets = [0, 32], sizes = [16, 32], strides = [1, 1]} : vector<16x64xf32> to vector<16x32xf32>
    %25 = vector.broadcast %13 : vector<1x32xf32> to vector<16x32xf32>
    %26 = arith.addf %24, %25 : vector<16x32xf32>
    %cst_4 = arith.constant dense<0.000000e+00> : vector<16x32xf32>
    %27 = tpu.matmul %4, %10, %cst_4 {dimension_numbers = #tpu.dot_dimension_numbers<[1], [0], [0], [1], [0, 0, 1, 1], [], []>} : vector<16x32xf32>, vector<32x32xf32>, vector<16x32xf32> -> vector<16x32xf32>
    %28 = vector.broadcast %14 : vector<1x32xf32> to vector<16x32xf32>
    %29 = arith.addf %27, %28 : vector<16x32xf32>
    %30 = vector.extract_strided_slice %23 {offsets = [0, 0], sizes = [16, 8], strides = [1, 1]} : vector<16x32xf32> to vector<16x8xf32>
    %31 = vector.shape_cast %30 : vector<16x8xf32> to vector<2x8x8xf32>
    %32 = vector.extract_strided_slice %23 {offsets = [0, 8], sizes = [16, 8], strides = [1, 1]} : vector<16x32xf32> to vector<16x8xf32>
    %33 = vector.shape_cast %32 : vector<16x8xf32> to vector<2x8x8xf32>
    %34 = vector.extract_strided_slice %23 {offsets = [0, 16], sizes = [16, 8], strides = [1, 1]} : vector<16x32xf32> to vector<16x8xf32>
    %35 = vector.shape_cast %34 : vector<16x8xf32> to vector<2x8x8xf32>
    %36 = vector.extract_strided_slice %23 {offsets = [0, 24], sizes = [16, 8], strides = [1, 1]} : vector<16x32xf32> to vector<16x8xf32>
    %37 = vector.shape_cast %36 : vector<16x8xf32> to vector<2x8x8xf32>
    %38 = tpu.concatenate %31, %33, %35, %37 in 0 : vector<2x8x8xf32>, vector<2x8x8xf32>, vector<2x8x8xf32>, vector<2x8x8xf32> -> vector<8x8x8xf32>
    %cst_5 = arith.constant 0.353553385 : f32
    %39 = vector.broadcast %cst_5 : f32 to vector<8x8x8xf32>
    %40 = arith.mulf %38, %39 : vector<8x8x8xf32>
    %41 = vector.extract_strided_slice %26 {offsets = [0, 0], sizes = [16, 8], strides = [1, 1]} : vector<16x32xf32> to vector<16x8xf32>
    %42 = vector.shape_cast %41 : vector<16x8xf32> to vector<2x8x8xf32>
    %43 = vector.extract_strided_slice %26 {offsets = [0, 8], sizes = [16, 8], strides = [1, 1]} : vector<16x32xf32> to vector<16x8xf32>
    %44 = vector.shape_cast %43 : vector<16x8xf32> to vector<2x8x8xf32>
    %45 = vector.extract_strided_slice %26 {offsets = [0, 16], sizes = [16, 8], strides = [1, 1]} : vector<16x32xf32> to vector<16x8xf32>
    %46 = vector.shape_cast %45 : vector<16x8xf32> to vector<2x8x8xf32>
    %47 = vector.extract_strided_slice %26 {offsets = [0, 24], sizes = [16, 8], strides = [1, 1]} : vector<16x32xf32> to vector<16x8xf32>
    %48 = vector.shape_cast %47 : vector<16x8xf32> to vector<2x8x8xf32>
    %49 = tpu.concatenate %42, %44, %46, %48 in 0 : vector<2x8x8xf32>, vector<2x8x8xf32>, vector<2x8x8xf32>, vector<2x8x8xf32> -> vector<8x8x8xf32>
    %50 = vector.extract_strided_slice %29 {offsets = [0, 0], sizes = [16, 8], strides = [1, 1]} : vector<16x32xf32> to vector<16x8xf32>
    %51 = vector.shape_cast %50 : vector<16x8xf32> to vector<2x8x8xf32>
    %52 = vector.extract_strided_slice %29 {offsets = [0, 8], sizes = [16, 8], strides = [1, 1]} : vector<16x32xf32> to vector<16x8xf32>
    %53 = vector.shape_cast %52 : vector<16x8xf32> to vector<2x8x8xf32>
    %54 = vector.extract_strided_slice %29 {offsets = [0, 16], sizes = [16, 8], strides = [1, 1]} : vector<16x32xf32> to vector<16x8xf32>
    %55 = vector.shape_cast %54 : vector<16x8xf32> to vector<2x8x8xf32>
    %56 = vector.extract_strided_slice %29 {offsets = [0, 24], sizes = [16, 8], strides = [1, 1]} : vector<16x32xf32> to vector<16x8xf32>
    %57 = vector.shape_cast %56 : vector<16x8xf32> to vector<2x8x8xf32>
    %58 = tpu.concatenate %51, %53, %55, %57 in 0 : vector<2x8x8xf32>, vector<2x8x8xf32>, vector<2x8x8xf32>, vector<2x8x8xf32> -> vector<8x8x8xf32>
    "tpu.trace_start"() <{level = 10 : i32, message = "bqd,bkd->bqk"}> : () -> ()
    %cst_6 = arith.constant dense<0.000000e+00> : vector<8x8x8xf32>
    %59 = tpu.matmul %40, %49, %cst_6 {dimension_numbers = #tpu.dot_dimension_numbers<[2], [2], [1], [1], [0, 0, 0, 1, 1, 1], [0], [0]>} : vector<8x8x8xf32>, vector<8x8x8xf32>, vector<8x8x8xf32> -> vector<8x8x8xf32>
    "tpu.trace_stop"() : () -> ()
    %60 = arith.addf %59, %19 : vector<8x8x8xf32>
    %cst_7 = arith.constant dense<0xFF800000> : vector<8x8xf32>
    %61 = vector.multi_reduction <maximumf>, %60, %cst_7 [2] : vector<8x8x8xf32> to vector<8x8xf32>
    %62 = vector.shape_cast %61 : vector<8x8xf32> to vector<8x8x1xf32>
    %63 = vector.broadcast %62 : vector<8x8x1xf32> to vector<8x8x8xf32>
    %64 = arith.subf %60, %63 : vector<8x8x8xf32>
    %65 = math.exp %64 : vector<8x8x8xf32>
    %cst_8 = arith.constant dense<0.000000e+00> : vector<8x8xf32>
    %66 = vector.multi_reduction <add>, %65, %cst_8 [2] : vector<8x8x8xf32> to vector<8x8xf32>
    %67 = vector.shape_cast %66 : vector<8x8xf32> to vector<8x8x1xf32>
    %68 = tpu.reciprocal %67 {approx = true} : vector<8x8x1xf32> -> vector<8x8x1xf32>
    %69 = vector.broadcast %68 : vector<8x8x1xf32> to vector<8x8x8xf32>
    %70 = arith.mulf %65, %69 : vector<8x8x8xf32>
    "tpu.trace_start"() <{level = 10 : i32, message = "bqk,bkd->bqd"}> : () -> ()
    %cst_9 = arith.constant dense<0.000000e+00> : vector<8x8x8xf32>
    %71 = tpu.matmul %70, %58, %cst_9 {dimension_numbers = #tpu.dot_dimension_numbers<[2], [1], [1], [2], [0, 0, 0, 1, 1, 2], [0], [0]>} : vector<8x8x8xf32>, vector<8x8x8xf32>, vector<8x8x8xf32> -> vector<8x8x8xf32>
    "tpu.trace_stop"() : () -> ()
    %72 = vector.extract_strided_slice %71 {offsets = [0, 0, 0], sizes = [2, 8, 8], strides = [1, 1, 1]} : vector<8x8x8xf32> to vector<2x8x8xf32>
    %73 = vector.shape_cast %72 : vector<2x8x8xf32> to vector<16x8xf32>
    %74 = vector.extract_strided_slice %71 {offsets = [2, 0, 0], sizes = [2, 8, 8], strides = [1, 1, 1]} : vector<8x8x8xf32> to vector<2x8x8xf32>
    %75 = vector.shape_cast %74 : vector<2x8x8xf32> to vector<16x8xf32>
    %76 = vector.extract_strided_slice %71 {offsets = [4, 0, 0], sizes = [2, 8, 8], strides = [1, 1, 1]} : vector<8x8x8xf32> to vector<2x8x8xf32>
    %77 = vector.shape_cast %76 : vector<2x8x8xf32> to vector<16x8xf32>
    %78 = vector.extract_strided_slice %71 {offsets = [6, 0, 0], sizes = [2, 8, 8], strides = [1, 1, 1]} : vector<8x8x8xf32> to vector<2x8x8xf32>
    %79 = vector.shape_cast %78 : vector<2x8x8xf32> to vector<16x8xf32>
    %80 = tpu.concatenate %73, %75, %77, %79 in 1 : vector<16x8xf32>, vector<16x8xf32>, vector<16x8xf32>, vector<16x8xf32> -> vector<16x32xf32>
    %cst_10 = arith.constant dense<0.000000e+00> : vector<16x32xf32>
    %81 = tpu.matmul %80, %11, %cst_10 {dimension_numbers = #tpu.dot_dimension_numbers<[1], [0], [0], [1], [0, 0, 1, 1], [], []>} : vector<16x32xf32>, vector<32x32xf32>, vector<16x32xf32> -> vector<16x32xf32>
    %82 = vector.broadcast %15 : vector<1x32xf32> to vector<16x32xf32>
    %83 = arith.addf %81, %82 : vector<16x32xf32>
    %84 = arith.addf %83, %7 : vector<16x32xf32>
    %85 = arith.addf %84, %4 : vector<16x32xf32>
    %cst_11 = arith.constant dense<0.000000e+00> : vector<16xf32>
    %86 = vector.multi_reduction <add>, %85, %cst_11 [1] : vector<16x32xf32> to vector<16xf32>
    %87 = vector.shape_cast %86 : vector<16xf32> to vector<16x1xf32>
    %cst_12 = arith.constant 3.200000e+01 : f32
    %88 = vector.broadcast %cst_12 : f32 to vector<16x1xf32>
    %89 = arith.divf %87, %88 : vector<16x1xf32>
    %90 = vector.broadcast %89 : vector<16x1xf32> to vector<16x32xf32>
    %91 = arith.subf %85, %90 : vector<16x32xf32>
    %92 = arith.mulf %91, %91 : vector<16x32xf32>
    %cst_13 = arith.constant dense<0.000000e+00> : vector<16xf32>
    %93 = vector.multi_reduction <add>, %92, %cst_13 [1] : vector<16x32xf32> to vector<16xf32>
    %94 = vector.shape_cast %93 : vector<16xf32> to vector<16x1xf32>
    %cst_14 = arith.constant 3.200000e+01 : f32
    %95 = vector.broadcast %cst_14 : f32 to vector<16x1xf32>
    %96 = arith.divf %94, %95 : vector<16x1xf32>
    %97 = vector.broadcast %89 : vector<16x1xf32> to vector<16x32xf32>
    %98 = arith.subf %85, %97 : vector<16x32xf32>
    %cst_15 = arith.constant 9.99999974E-6 : f32
    %99 = vector.broadcast %cst_15 : f32 to vector<16x1xf32>
    %100 = arith.addf %96, %99 : vector<16x1xf32>
    %101 = math.rsqrt %100 : vector<16x1xf32>
    %102 = vector.broadcast %101 : vector<16x1xf32> to vector<16x32xf32>
    %103 = arith.mulf %98, %102 : vector<16x32xf32>
    %104 = vector.broadcast %16 : vector<1x32xf32> to vector<16x32xf32>
    %105 = arith.mulf %103, %104 : vector<16x32xf32>
    %106 = vector.broadcast %17 : vector<1x32xf32> to vector<16x32xf32>
    %107 = arith.addf %105, %106 : vector<16x32xf32>
    %108 = vector.extract_strided_slice %107 {offsets = [0, 0], sizes = [1, 32], strides = [1, 1]} : vector<16x32xf32> to vector<1x32xf32>
    %109 = vector.extract_strided_slice %107 {offsets = [1, 0], sizes = [1, 32], strides = [1, 1]} : vector<16x32xf32> to vector<1x32xf32>
    %110 = vector.extract_strided_slice %107 {offsets = [2, 0], sizes = [1, 32], strides = [1, 1]} : vector<16x32xf32> to vector<1x32xf32>
    %111 = vector.extract_strided_slice %107 {offsets = [3, 0], sizes = [1, 32], strides = [1, 1]} : vector<16x32xf32> to vector<1x32xf32>
    %112 = tpu.concatenate %108, %109, %110, %111 in 1 : vector<1x32xf32>, vector<1x32xf32>, vector<1x32xf32>, vector<1x32xf32> -> vector<1x128xf32>
    %113 = vector.extract_strided_slice %107 {offsets = [4, 0], sizes = [1, 32], strides = [1, 1]} : vector<16x32xf32> to vector<1x32xf32>
    %114 = vector.extract_strided_slice %107 {offsets = [5, 0], sizes = [1, 32], strides = [1, 1]} : vector<16x32xf32> to vector<1x32xf32>
    %115 = vector.extract_strided_slice %107 {offsets = [6, 0], sizes = [1, 32], strides = [1, 1]} : vector<16x32xf32> to vector<1x32xf32>
    %116 = vector.extract_strided_slice %107 {offsets = [7, 0], sizes = [1, 32], strides = [1, 1]} : vector<16x32xf32> to vector<1x32xf32>
    %117 = tpu.concatenate %113, %114, %115, %116 in 1 : vector<1x32xf32>, vector<1x32xf32>, vector<1x32xf32>, vector<1x32xf32> -> vector<1x128xf32>
    %118 = vector.extract_strided_slice %107 {offsets = [8, 0], sizes = [1, 32], strides = [1, 1]} : vector<16x32xf32> to vector<1x32xf32>
    %119 = vector.extract_strided_slice %107 {offsets = [9, 0], sizes = [1, 32], strides = [1, 1]} : vector<16x32xf32> to vector<1x32xf32>
    %120 = vector.extract_strided_slice %107 {offsets = [10, 0], sizes = [1, 32], strides = [1, 1]} : vector<16x32xf32> to vector<1x32xf32>
    %121 = vector.extract_strided_slice %107 {offsets = [11, 0], sizes = [1, 32], strides = [1, 1]} : vector<16x32xf32> to vector<1x32xf32>
    %122 = tpu.concatenate %118, %119, %120, %121 in 1 : vector<1x32xf32>, vector<1x32xf32>, vector<1x32xf32>, vector<1x32xf32> -> vector<1x128xf32>
    %123 = vector.extract_strided_slice %107 {offsets = [12, 0], sizes = [1, 32], strides = [1, 1]} : vector<16x32xf32> to vector<1x32xf32>
    %124 = vector.extract_strided_slice %107 {offsets = [13, 0], sizes = [1, 32], strides = [1, 1]} : vector<16x32xf32> to vector<1x32xf32>
    %125 = vector.extract_strided_slice %107 {offsets = [14, 0], sizes = [1, 32], strides = [1, 1]} : vector<16x32xf32> to vector<1x32xf32>
    %126 = vector.extract_strided_slice %107 {offsets = [15, 0], sizes = [1, 32], strides = [1, 1]} : vector<16x32xf32> to vector<1x32xf32>
    %127 = tpu.concatenate %123, %124, %125, %126 in 1 : vector<1x32xf32>, vector<1x32xf32>, vector<1x32xf32>, vector<1x32xf32> -> vector<1x128xf32>
    %128 = tpu.concatenate %112, %117, %122, %127 in 0 : vector<1x128xf32>, vector<1x128xf32>, vector<1x128xf32>, vector<1x128xf32> -> vector<4x128xf32>
    %c0_16 = arith.constant 0 : index
    %c0_17 = arith.constant 0 : index
    %129 = vector.load %arg2[%c0_16, %c0_17] : memref<4x128xf32, #tpu.memory_space<vmem>>, vector<4x128xf32>
    tpu.vector_store %arg2[%c0_16, %c0_17], %128 {strides = array<i32>} : memref<4x128xf32, #tpu.memory_space<vmem>>, vector<4x128xf32>,
    return
  }
}

</mosaic_0001>

<bundles_post_ra>
// kernel: ddi_forward.1
= control target key start
LH: loop header
LB: loop body
LE: loop exit
PB: predicated region body
PF: predicated region fallthrough
CT: control target
= control target key end

     0   :  { %v118_v0 = vlaneseq  ;;  %s2055_s13 = smov 96   ;;  %vm36_vm0 = vcmask 261120   ;;  %s2056_s23 = smov 32   ;;  %v2060_v20 = vmov 0.0   ;;  %vm2062_vm1 = vmmov 0   ;;  %s2358_s0 = inlined_call_operand.vmem [shape: f32[2,8,128], index: 0, kind: input, shape index: {}]   ;;  %s2359_s1 = inlined_call_operand.vmem [shape: f32[104,128], index: 1, kind: input, shape index: {}]   ;;  %s2360_s2 = inlined_call_operand.vmem [shape: f32[4,128], index: 2, kind: output, shape index: {}]  }
   0x1   :  { %v2084_v1 = vld [vmem:[%s2358_s0] sm:$0xff]  ;;  %v2089_v2 = vld [vmem:[%s2359_s1 + $0x18] sm:$0xff]  ;;  %v2097_v3 = vld [vmem:[%s2359_s1 + $0x10] sm:$0xff]  ;;  %s2057_s24 = smov 120   ;;  %s2058_s25 = smov 112   ;;  %vm297_vm2 = vcmask 64512  }
   0x2   :  { %15 = vrot.lane.b32.xlu0 %v2084_v1, %s2055_s13  ;;  %1895 = vmatprep.subr.mxu0 %v2089_v2  ;;  %v2099_v4 = vshrl.u32 %v118_v0, 7  ;;  %v2104_v5 = vld [vmem:[%s2358_s0 + $0x8] sm:$0xff]  ;;  %v2115_v7 = vld [vmem:[%s2359_s1 + $0x20] sm:$0xff]  ;;  %s2059_s26 = smov 104   ;;  %s2061_s27 = smov 64   ;;  %vm1610_vm3 = vcmask 130048  }
   0x3   :  { %1896 = vmatpush3.msra.mxu0 %v2089_v2  ;;  %v2110_v6 = vld [vmem:[%s2359_s1 + $0x8] sm:$0xff]  ;;  %1914 = vmatprep.mubr.msk.f32.mxu1 %vm36_vm0, %v2084_v1  ;;  %v2125_v9 = vld [vmem:[%s2359_s1] sm:$0xff]  ;;  %s2064_s17 = smov 16   ;;  %s2065_s18 = smov 24   ;;  %vm1613_vm4 = vcmask 195584   ;;  %vm1776_vm5 = vcmask 523264  }
   0x4   :  { %1897 = vmatprep.subr.mxu0 %v2097_v3  ;;  %v126_v8 = vsub.s32 1, %v2099_v4  ;;  %v120_v21 = vsub.s32 0, %v2099_v4  ;;  %v136_v57 = vsub.s32 2, %v2099_v4  ;;  %v28_v62 = vld [vmem:[%s2359_s1 + $0x28] sm:$0xff]  ;;  %vm1778_vm6 = vcmask 785408  }
   0x5   :  { %1898 = vmatpush3.msra.mxu0 %v2097_v3  ;;  %vm1804_vm7 = vcmask 1040384   ;;  %vm1806_vm8 = vcmask 1041408   ;;  %vm1808_vm9 = vcmask 1042432  }
   0x6   :  { %17 = vrot.lane.b32.xlu0 %v2104_v5, %s2055_s13  ;;  %1899 = vmatprep.subr.mxu0 %v2110_v6  ;;  %v127_v10 = vrot.slane %v2115_v7, %v126_v8  ;;  %v121_v22 = vrot.slane %v2115_v7, %v120_v21  ;;  %v137_v58 = vrot.slane %v2115_v7, %v136_v57 }
   0x7   :  { %1900 = vmatpush3.msra.mxu0 %v2110_v6 }
   0x8   :  { %1901 = vmatprep.subr.mxu0 %v2125_v9  ;;  %129 = vrot.lane.b32.xlu1 %v127_v10, %s2056_s23 }
   0x9   :  { %1902 = vmatpush3.msra.mxu0 %v2125_v9 }
   0xa   :  { %1927 = vmatprep.subr.mxu0 %v2060_v20 }
  0x74   :  { %v16_v11 = vpop.permute.xlu0 %15 }
  0x75   :  { %v21_v12 = vadd.f32 %v16_v11, %v2084_v1  ;;  %v29_v11 = vld [vmem:[%s2359_s1 + $0x30] sm:$0xff] }
  0x77   :  { %1903 = vmatprep.mubr.msk.f32.mxu0 %vm36_vm0, %v21_v12 }
  0x78   :  { %v18_v13 = vpop.permute.xlu0 %17 }
  0x79   :  { %v22_v14 = vadd.f32 %v18_v13, %v2104_v5 }
  0x7a   :  { %v130_v15 = vpop.permute.xlu1 %129 }
  0x7b   :  { %1904 = vmatmul.mubr.msk.f32.vlgmr.msra.gmra.mxu0 %vm36_vm0, %v22_v14 }
  0x7c   :  { %1929 = vmatprep.mubr.msk.f32.mxu0 %vm2062_vm1, %v2060_v20 }
 0x13b   :  { %v1905_v16 = vpop.f32.mrf.mxu0 }
 0x13c   :  { %v133_v17 = vadd.f32 %v1905_v16, %v130_v15  ;;  %v123_v23 = vadd.f32 %v1905_v16, %v121_v22 }
 0x13d   :  { %v109_v18 = vpop.f32.mrf.mxu0 }
 0x13e   :  { %v132_v19 = vadd.f32 %v130_v15, %v109_v18  ;;  %265 = vrot.lane.b32.xlu0 %v133_v17, %s2057_s24  ;;  %v122_v24 = vadd.f32 %v121_v22, %v109_v18  ;;  %v254_v38 = vmul.f32 0.35355338, %v123_v23  ;;  %v33_v22 = vld [vmem:[%s2359_s1 + $0x50] sm:$0xff] }
 0x140   :  { %263 = vrot.lane.b32.xlu1 %v132_v19, %s2057_s24  ;;  %v253_v36 = vmul.f32 0.35355338, %v122_v24 }
 0x142   :  { %269 = vrot.lane.b32.xlu0 %v133_v17, %s2058_s25 }
 0x144   :  { %267 = vrot.lane.b32.xlu1 %v132_v19, %s2058_s25 }
 0x146   :  { %273 = vrot.lane.b32.xlu0 %v133_v17, %s2059_s26 }
 0x148   :  { %271 = vrot.lane.b32.xlu1 %v132_v19, %s2059_s26 }
 0x14a   :  { %146 = vrot.lane.b32.xlu0 %v2097_v3, %s2061_s27 }
 0x14c   :  { %148 = vrot.lane.b32.xlu1 %v2089_v2, %s2061_s27 }
 0x14e   :  { %142 = vrot.lane.b32.xlu0 %v2125_v9, %s2061_s27 }
 0x150   :  { %144 = vrot.lane.b32.xlu1 %v2110_v6, %s2061_s27 }
 0x152   :  { %373 = vrot.lane.b32.xlu0 %v133_v17, %s2055_s13  ;;  %v31_v17 = vld [vmem:[%s2359_s1 + $0x40] sm:$0xff] }
 0x154   :  { %295 = vrot.lane.b32.xlu1 %v132_v19, %s2055_s13 }
 0x156   :  { %237 = vrot.lane.b32.xlu0 %v123_v23, %s2057_s24 }
 0x15a   :  { %243 = vrot.lane.b32.xlu0 %v123_v23, %s2058_s25 }
 0x15e   :  { %235 = vrot.lane.b32.xlu0 %v122_v24, %s2057_s24 }
 0x162   :  { %241 = vrot.lane.b32.xlu0 %v122_v24, %s2058_s25 }
 0x166   :  { %247 = vrot.lane.b32.xlu0 %v122_v24, %s2059_s26 }
 0x16a   :  { %249 = vrot.lane.b32.xlu0 %v123_v23, %s2059_s26 }
 0x1b0   :  { %v266_v25 = vpop.permute.xlu0 %265 }
 0x1b1   :  { %527 = vrot.lane.b32.xlu1 %v266_v25, %s2055_s13 }
 0x1b2   :  { %v264_v26 = vpop.permute.xlu1 %263 }
 0x1b4   :  { %v270_v27 = vpop.permute.xlu0 %269 }
 0x1b5   :  { %681 = vrot.lane.b32.xlu1 %v270_v27, %s2055_s13  ;;  %v30_v27 = vld [vmem:[%s2359_s1 + $0x38] sm:$0xff] }
 0x1b6   :  { %v268_v28 = vpop.permute.xlu1 %267 }
 0x1b8   :  { %v274_v29 = vpop.permute.xlu0 %273 }
 0x1b9   :  { %450 = vrot.lane.b32.xlu1 %v264_v26, %s2055_s13 }
 0x1ba   :  { %v272_v30 = vpop.permute.xlu1 %271 }
 0x1bc   :  { %v147_v31 = vpop.permute.xlu0 %146 }
 0x1bd   :  { %604 = vrot.lane.b32.xlu1 %v268_v28, %s2055_s13 }
 0x1be   :  { %v149_v32 = vpop.permute.xlu1 %148 }
 0x1bf   :  { %1906 = vmatprep.subr.mxu1 %v149_v32 }
 0x1c0   :  { %1907 = vmatpush3.msra.mxu1 %v149_v32  ;;  %v143_v34 = vpop.permute.xlu0 %142  ;;  %v32_v32 = vld [vmem:[%s2359_s1 + $0x48] sm:$0xff] }
 0x1c1   :  { %758 = vrot.lane.b32.xlu1 %v272_v30, %s2055_s13  ;;  %1908 = vmatprep.subr.mxu1 %v147_v31 }
 0x1c2   :  { %1909 = vmatpush3.msra.mxu1 %v147_v31  ;;  %v145_v33 = vpop.permute.xlu1 %144 }
 0x1c3   :  { %1910 = vmatprep.subr.mxu1 %v145_v33 }
 0x1c4   :  { %1911 = vmatpush3.msra.mxu1 %v145_v33  ;;  %v374_v37 = vpop.permute.xlu0 %373 }
 0x1c5   :  { %835 = vrot.lane.b32.xlu1 %v274_v29, %s2055_s13  ;;  %1912 = vmatprep.subr.mxu1 %v143_v34 }
 0x1c6   :  { %1913 = vmatpush3.msra.mxu1 %v143_v34  ;;  %v296_v35 = vpop.permute.xlu1 %295 }
 0x1c7   :  { %1915 = vmatmul.mubr.msk.f32.vlgmr.msra.gmra.mxu1 %vm36_vm0, %v2104_v5  ;;  %1917 = vmatprep.subr.mxu1 %v2060_v20 }
 0x1c8   :  { %1918 = vmatpush3.xpose.msk.msra.mxu1 %vm297_vm2, %v296_v35  ;;  %1919 = vmatprep.mubr.msk.f32.mxu1 %vm2062_vm1, %v2060_v20  ;;  %v238_v39 = vpop.permute.xlu0 %237 }
 0x1c9   :  { %1922 = vmatprep.subr.mxu1 %v2060_v20  ;;  %v256_v43 = vmul.f32 0.35355338, %v238_v39 }
 0x1cb   :  { %1920 = vmatmul.mubr.msk.f32.vlgmr.msra.gmra.mxu1 %vm297_vm2, %v253_v36 }
 0x1cc   :  { %1923 = vmatpush3.xpose.msk.msra.mxu1 %vm297_vm2, %v374_v37  ;;  %1924 = vmatprep.mubr.msk.f32.mxu1 %vm2062_vm1, %v2060_v20  ;;  %v244_v40 = vpop.permute.xlu0 %243  ;;  %v34_v37 = vld [vmem:[%s2359_s1 + $0x58] sm:$0xff] }
 0x1cd   :  { %1932 = vmatprep.subr.mxu1 %v2060_v20  ;;  %v258_v45 = vmul.f32 0.35355338, %v244_v40 }
 0x1cf   :  { %1925 = vmatmul.mubr.msk.f32.vlgmr.msra.gmra.mxu1 %vm297_vm2, %v254_v38 }
 0x1d0   :  { %1934 = vmatprep.mubr.msk.f32.mxu1 %vm2062_vm1, %v2060_v20  ;;  %v236_v42 = vpop.permute.xlu0 %235 }
 0x1d1   :  { %v255_v48 = vmul.f32 0.35355338, %v236_v42  ;;  %v35_v42 = vld [vmem:[%s2359_s1 + $0x60] sm:$0xff]  ;;  %s2063_s1 = smov 8  }
 0x1d4   :  { %v242_v46 = vpop.permute.xlu0 %241 }
 0x1d5   :  { %v257_v51 = vmul.f32 0.35355338, %v242_v46 }
 0x1d8   :  { %v248_v50 = vpop.permute.xlu0 %247 }
 0x1d9   :  { %v259_v53 = vmul.f32 0.35355338, %v248_v50 }
 0x1dc   :  { %v250_v54 = vpop.permute.xlu0 %249 }
 0x1dd   :  { %v260_v56 = vmul.f32 0.35355338, %v250_v54 }
 0x223   :  { %v528_v41 = vpop.permute.xlu1 %527 }
 0x224   :  { %1933 = vmatpush3.xpose.msk.msra.mxu1 %vm297_vm2, %v528_v41 }
 0x225   :  { %1942 = vmatprep.subr.mxu1 %v2060_v20 }
 0x227   :  { %v682_v44 = vpop.permute.xlu1 %681  ;;  %1935 = vmatmul.mubr.msk.f32.vlgmr.msra.gmra.mxu1 %vm297_vm2, %v256_v43 }
 0x228   :  { %1943 = vmatpush3.xpose.msk.msra.mxu1 %vm297_vm2, %v682_v44  ;;  %1944 = vmatprep.mubr.msk.f32.mxu1 %vm2062_vm1, %v2060_v20 }
 0x229   :  { %1952 = vmatprep.subr.mxu1 %v2060_v20 }
 0x22b   :  { %v451_v47 = vpop.permute.xlu1 %450  ;;  %1945 = vmatmul.mubr.msk.f32.vlgmr.msra.gmra.mxu1 %vm297_vm2, %v258_v45 }
 0x22c   :  { %1928 = vmatpush3.xpose.msk.msra.mxu0 %vm297_vm2, %v451_v47  ;;  %1954 = vmatprep.mubr.msk.f32.mxu1 %vm2062_vm1, %v2060_v20 }
 0x22d   :  { %1937 = vmatprep.subr.mxu0 %v2060_v20 }
 0x22f   :  { %v605_v49 = vpop.permute.xlu1 %604  ;;  %1930 = vmatmul.mubr.msk.f32.vlgmr.msra.gmra.mxu0 %vm297_vm2, %v255_v48 }
 0x230   :  { %1938 = vmatpush3.xpose.msk.msra.mxu0 %vm297_vm2, %v605_v49  ;;  %1939 = vmatprep.mubr.msk.f32.mxu0 %vm2062_vm1, %v2060_v20 }
 0x231   :  { %1947 = vmatprep.subr.mxu0 %v2060_v20 }
 0x233   :  { %v759_v52 = vpop.permute.xlu1 %758  ;;  %1940 = vmatmul.mubr.msk.f32.vlgmr.msra.gmra.mxu0 %vm297_vm2, %v257_v51 }
 0x234   :  { %1948 = vmatpush3.xpose.msk.msra.mxu0 %vm297_vm2, %v759_v52  ;;  %1949 = vmatprep.mubr.msk.f32.mxu0 %vm2062_vm1, %v2060_v20 }
 0x235   :  { %1957 = vmatprep.subr.mxu0 %v2060_v20 }
 0x237   :  { %v836_v55 = vpop.permute.xlu1 %835  ;;  %1950 = vmatmul.mubr.msk.f32.vlgmr.msra.gmra.mxu0 %vm297_vm2, %v259_v53 }
 0x238   :  { %1953 = vmatpush3.xpose.msk.msra.mxu1 %vm297_vm2, %v836_v55  ;;  %1959 = vmatprep.mubr.msk.f32.mxu0 %vm2062_vm1, %v2060_v20 }
 0x239   :  { %1962 = vmatprep.subr.mxu1 %v2060_v20 }
 0x23b   :  { %1955 = vmatmul.mubr.msk.f32.vlgmr.msra.gmra.mxu1 %vm297_vm2, %v260_v56 }
 0x23c   :  { %1964 = vmatprep.mubr.msk.f32.mxu1 %vm2062_vm1, %v2060_v20 }
 0x287   :  { %v1916_v59 = vpop.f32.mrf.mxu1 }
 0x288   :  { %v2219_v60 = vadd.f32 %v1916_v59, %v137_v58 }
 0x289   :  { %v224_v61 = vpop.f32.mrf.mxu1 }
 0x28a   :  { %v2224_v63 = vadd.f32 %v224_v61, %v137_v58  ;;  %1963 = vmatpush3.msra.mxu1 %v2219_v60 }
 0x28b   :  { %v369_v0 = vpop.f32.mrf.mxu1  ;;  %1972 = vmatprep.subr.mxu1 %v2060_v20 }
 0x28c   :  { %v370_v8 = vadd.f32 %v369_v0, %v28_v62  ;;  %1958 = vmatpush3.msra.mxu0 %v2224_v63 }
 0x28d   :  { %v1921_v10 = vpop.f32.mrf.mxu1  ;;  %1967 = vmatprep.subr.mxu0 %v2060_v20 }
 0x28e   :  { %v912_v12 = vsel %vm297_vm2, %v370_v8, -inf }
 0x28f   :  { %913 = vmax.xlane.f32.xlu1 %v912_v12  ;;  %v446_v13 = vpop.f32.mrf.mxu1 }
 0x290   :  { %v447_v14 = vadd.f32 %v446_v13, %v29_v11 }
 0x291   :  { %v1926_v15 = vpop.f32.mrf.mxu1 }
 0x292   :  { %v915_v16 = vsel %vm297_vm2, %v447_v14, -inf }
 0x293   :  { %916 = vmax.xlane.f32.xlu0 %v915_v16 }
 0x2e7   :  { %v600_v18 = vpop.f32.mrf.mxu1 }
 0x2e8   :  { %v601_v19 = vadd.f32 %v600_v18, %v31_v17 }
 0x2e9   :  { %v1936_v21 = vpop.f32.mrf.mxu1 }
 0x2ea   :  { %v921_v23 = vsel %vm297_vm2, %v601_v19, -inf }
 0x2eb   :  { %922 = vmax.xlane.f32.xlu1 %v921_v23  ;;  %v754_v24 = vpop.f32.mrf.mxu1 }
 0x2ec   :  { %v755_v25 = vadd.f32 %v754_v24, %v33_v22 }
 0x2ed   :  { %v1946_v26 = vpop.f32.mrf.mxu1 }
 0x2ee   :  { %v927_v28 = vsel %vm297_vm2, %v755_v25, -inf }
 0x2ef   :  { %v523_v29 = vpop.f32.mrf.mxu0  ;;  %928 = vmax.xlane.f32.xlu1 %v927_v28 }
 0x2f0   :  { %v524_v30 = vadd.f32 %v523_v29, %v30_v27 }
 0x2f1   :  { %v1931_v31 = vpop.f32.mrf.mxu0 }
 0x2f2   :  { %v918_v33 = vsel %vm297_vm2, %v524_v30, -inf }
 0x2f3   :  { %v677_v34 = vpop.f32.mrf.mxu0  ;;  %919 = vmax.xlane.f32.xlu0 %v918_v33 }
 0x2f4   :  { %v678_v35 = vadd.f32 %v677_v34, %v32_v32 }
 0x2f5   :  { %v1941_v36 = vpop.f32.mrf.mxu0 }
 0x2f6   :  { %v924_v38 = vsel %vm297_vm2, %v678_v35, -inf }
 0x2f7   :  { %v831_v39 = vpop.f32.mrf.mxu0  ;;  %925 = vmax.xlane.f32.xlu0 %v924_v38 }
 0x2f8   :  { %v832_v40 = vadd.f32 %v831_v39, %v34_v37 }
 0x2f9   :  { %v1951_v41 = vpop.f32.mrf.mxu0 }
 0x2fa   :  { %v930_v43 = vsel %vm297_vm2, %v832_v40, -inf }
 0x2fb   :  { %931 = vmax.xlane.f32.xlu0 %v930_v43  ;;  %v908_v44 = vpop.f32.mrf.mxu1 }
 0x2fc   :  { %v909_v45 = vadd.f32 %v908_v44, %v35_v42 }
 0x2fd   :  { %v1956_v46 = vpop.f32.mrf.mxu1 }
 0x2fe   :  { %v933_v47 = vsel %vm297_vm2, %v909_v45, -inf }
 0x2ff   :  { %934 = vmax.xlane.f32.xlu1 %v933_v47 }
 0x310   :  { %279 = vrot.lane.b32.xlu1 %v2219_v60, %s2057_s24 }
 0x311   :  { %277 = vrot.lane.b32.xlu0 %v2224_v63, %s2057_s24 }
 0x314   :  { %283 = vrot.lane.b32.xlu1 %v2224_v63, %s2058_s25 }
 0x315   :  { %285 = vrot.lane.b32.xlu0 %v2219_v60, %s2058_s25 }
 0x318   :  { %v914_v48 = vpop.xlane.xlu1 %913 }
 0x319   :  { %v936_v49 = vsub.f32 %v370_v8, %v914_v48 }
 0x31b   :  { %v944_v51 = vmul.f32 1.442695, %v936_v49 }
 0x31c   :  { %v917_v50 = vpop.xlane.xlu0 %916 }
 0x31d   :  { %v937_v52 = vsub.f32 %v447_v14, %v917_v50  ;;  %2019 = vpow2.f32 %v944_v51 }
 0x31f   :  { %v946_v53 = vmul.f32 1.442695, %v937_v52 }
 0x321   :  { %2021 = vpow2.f32 %v946_v53 }
 0x32a   :  { %v2020_v54 = vpop.eup %2019 }
 0x32b   :  { %v960_v55 = vsel %vm297_vm2, %v2020_v54, 0.0 }
 0x32e   :  { %v2268_v56 = vpop.eup %2021 }
 0x32f   :  { %v963_v57 = vsel %vm297_vm2, %v2268_v56, 0.0 }
 0x334   :  { %961 = vadd.xlane.f32.xlu0 %v960_v55 }
 0x338   :  { %964 = vadd.xlane.f32.xlu1 %v963_v57 }
 0x374   :  { %v923_v58 = vpop.xlane.xlu1 %922 }
 0x375   :  { %v939_v59 = vsub.f32 %v601_v19, %v923_v58 }
 0x377   :  { %v950_v61 = vmul.f32 1.442695, %v939_v59 }
 0x378   :  { %v929_v62 = vpop.xlane.xlu1 %928 }
 0x379   :  { %2023 = vpow2.f32 %v950_v61  ;;  %v941_v0 = vsub.f32 %v755_v25, %v929_v62 }
 0x37b   :  { %v954_v8 = vmul.f32 1.442695, %v941_v0 }
 0x37c   :  { %v920_v10 = vpop.xlane.xlu0 %919 }
 0x37d   :  { %2025 = vpow2.f32 %v954_v8  ;;  %v938_v11 = vsub.f32 %v524_v30, %v920_v10 }
 0x37f   :  { %v948_v12 = vmul.f32 1.442695, %v938_v11 }
 0x380   :  { %v926_v13 = vpop.xlane.xlu0 %925 }
 0x381   :  { %2027 = vpow2.f32 %v948_v12  ;;  %v940_v14 = vsub.f32 %v678_v35, %v926_v13 }
 0x383   :  { %v952_v15 = vmul.f32 1.442695, %v940_v14 }
 0x384   :  { %v932_v16 = vpop.xlane.xlu0 %931 }
 0x385   :  { %2029 = vpow2.f32 %v952_v15  ;;  %v942_v17 = vsub.f32 %v832_v40, %v932_v16 }
 0x386   :  { %v2024_v18 = vpop.eup %2023 }
 0x387   :  { %v956_v21 = vmul.f32 1.442695, %v942_v17  ;;  %v969_v19 = vsel %vm297_vm2, %v2024_v18, 0.0 }
 0x388   :  { %v935_v22 = vpop.xlane.xlu1 %934  ;;  %970 = vadd.xlane.f32.xlu1 %v969_v19  ;;  %v278_v35 = vpop.permute.xlu0 %277 }
 0x389   :  { %2031 = vpow2.f32 %v956_v21  ;;  %v943_v23 = vsub.f32 %v909_v45, %v935_v22 }
 0x38a   :  { %v2026_v24 = vpop.eup %2025 }
 0x38b   :  { %v958_v25 = vmul.f32 1.442695, %v943_v23  ;;  %v975_v26 = vsel %vm297_vm2, %v2026_v24, 0.0 }
 0x38c   :  { %976 = vadd.xlane.f32.xlu1 %v975_v26  ;;  %v280_v36 = vpop.permute.xlu1 %279  ;;  %v286_v37 = vpop.permute.xlu0 %285 }
 0x38d   :  { %2033 = vpow2.f32 %v958_v25 }
 0x38e   :  { %v2028_v27 = vpop.eup %2027 }
 0x38f   :  { %v966_v28 = vsel %vm297_vm2, %v2028_v27, 0.0 }
 0x390   :  { %967 = vadd.xlane.f32.xlu0 %v966_v28  ;;  %v284_v38 = vpop.permute.xlu1 %283 }
 0x392   :  { %v2275_v29 = vpop.eup %2029 }
 0x393   :  { %v972_v30 = vsel %vm297_vm2, %v2275_v29, 0.0 }
 0x394   :  { %973 = vadd.xlane.f32.xlu0 %v972_v30 }
 0x396   :  { %v2279_v31 = vpop.eup %2031 }
 0x397   :  { %v978_v32 = vsel %vm297_vm2, %v2279_v31, 0.0 }
 0x398   :  { %979 = vadd.xlane.f32.xlu0 %v978_v32 }
 0x39a   :  { %v2283_v33 = vpop.eup %2033 }
 0x39b   :  { %v981_v34 = vsel %vm297_vm2, %v2283_v33, 0.0 }
 0x39c   :  { %982 = vadd.xlane.f32.xlu1 %v981_v34 }
 0x3ad   :  { %289 = vrot.lane.b32.xlu1 %v2224_v63, %s2059_s26 }
 0x3ae   :  { %291 = vrot.lane.b32.xlu0 %v2219_v60, %s2059_s26 }
 0x3b1   :  { %1626 = vrot.lane.b32.xlu1 %v2089_v2, %s2056_s23 }
 0x3b2   :  { %1624 = vrot.lane.b32.xlu0 %v2097_v3, %s2056_s23 }
 0x3b6   :  { %1622 = vrot.lane.b32.xlu0 %v2110_v6, %s2056_s23 }
 0x3bd   :  { %v962_v39 = vpop.xlane.xlu0 %961 }
 0x3be   :  { %2035 = vrcp.f32 %v962_v39 }
 0x3c1   :  { %v965_v40 = vpop.xlane.xlu1 %964 }
 0x3c2   :  { %2037 = vrcp.f32 %v965_v40 }
 0x3cb   :  { %v2036_v63 = vpop.eup %2035 }
 0x3cc   :  { %v992_v41 = vmul.f32 %v2036_v63, %v2020_v54 }
 0x3ce   :  { %1960 = vmatmul.mubr.msk.f32.vlgmr.msra.gmra.mxu0 %vm297_vm2, %v992_v41 }
 0x3cf   :  { %v2038_v60 = vpop.eup %2037  ;;  %1968 = vmatpush3.msra.mxu0 %v278_v35  ;;  %1969 = vmatprep.mubr.msk.f32.mxu0 %vm2062_vm1, %v2060_v20 }
 0x3d0   :  { %v993_v2 = vmul.f32 %v2038_v60, %v2268_v56  ;;  %1977 = vmatprep.subr.mxu0 %v2060_v20 }
 0x3d2   :  { %1965 = vmatmul.mubr.msk.f32.vlgmr.msra.gmra.mxu1 %vm297_vm2, %v993_v2 }
 0x3d3   :  { %1973 = vmatpush3.msra.mxu1 %v280_v36  ;;  %1974 = vmatprep.mubr.msk.f32.mxu1 %vm2062_vm1, %v2060_v20 }
 0x3d4   :  { %1982 = vmatprep.subr.mxu1 %v2060_v20 }
 0x411   :  { %v971_v3 = vpop.xlane.xlu1 %970 }
 0x412   :  { %2039 = vrcp.f32 %v971_v3 }
 0x415   :  { %v977_v6 = vpop.xlane.xlu1 %976 }
 0x416   :  { %2041 = vrcp.f32 %v977_v6 }
 0x419   :  { %v968_v42 = vpop.xlane.xlu0 %967 }
 0x41a   :  { %2043 = vrcp.f32 %v968_v42 }
 0x41d   :  { %v974_v43 = vpop.xlane.xlu0 %973 }
 0x41e   :  { %2045 = vrcp.f32 %v974_v43 }
 0x41f   :  { %v2040_v44 = vpop.eup %2039 }
 0x420   :  { %v995_v45 = vmul.f32 %v2040_v44, %v2024_v18 }
 0x421   :  { %v980_v46 = vpop.xlane.xlu0 %979 }
 0x422   :  { %2047 = vrcp.f32 %v980_v46  ;;  %1975 = vmatmul.mubr.msk.f32.vlgmr.msra.gmra.mxu1 %vm297_vm2, %v995_v45 }
 0x423   :  { %v2042_v47 = vpop.eup %2041  ;;  %1983 = vmatpush3.msra.mxu1 %v286_v37  ;;  %1984 = vmatprep.mubr.msk.f32.mxu1 %vm2062_vm1, %v2060_v20  ;;  %v1618_v37 = vsub.s32 3, %v2099_v4 }
 0x424   :  { %1992 = vmatprep.subr.mxu1 %v2060_v20  ;;  %v997_v48 = vmul.f32 %v2042_v47, %v2026_v24 }
 0x425   :  { %v983_v49 = vpop.xlane.xlu1 %982  ;;  %v292_v50 = vpop.permute.xlu0 %291 }
 0x426   :  { %2049 = vrcp.f32 %v983_v49  ;;  %1985 = vmatmul.mubr.msk.f32.vlgmr.msra.gmra.mxu1 %vm297_vm2, %v997_v48 }
 0x427   :  { %v2044_v51 = vpop.eup %2043  ;;  %1993 = vmatpush3.msra.mxu1 %v292_v50  ;;  %1994 = vmatprep.mubr.msk.f32.mxu1 %vm2062_vm1, %v2060_v20 }
 0x428   :  { %v994_v52 = vmul.f32 %v2044_v51, %v2028_v27 }
 0x429   :  { %v290_v55 = vpop.permute.xlu1 %289  ;;  %v1625_v11 = vpop.permute.xlu0 %1624 }
 0x42a   :  { %1970 = vmatmul.mubr.msk.f32.vlgmr.msra.gmra.mxu0 %vm297_vm2, %v994_v52 }
 0x42b   :  { %v2046_v53 = vpop.eup %2045  ;;  %1978 = vmatpush3.msra.mxu0 %v284_v38  ;;  %1979 = vmatprep.mubr.msk.f32.mxu0 %vm2062_vm1, %v2060_v20  ;;  %v1619_v38 = vrot.slane %v2115_v7, %v1618_v37 }
 0x42c   :  { %1987 = vmatprep.subr.mxu0 %v2060_v20  ;;  %v996_v54 = vmul.f32 %v2046_v53, %v2275_v29 }
 0x42d   :  { %v1627_v61 = vpop.permute.xlu1 %1626 }
 0x42e   :  { %1980 = vmatmul.mubr.msk.f32.vlgmr.msra.gmra.mxu0 %vm297_vm2, %v996_v54 }
 0x42f   :  { %v2048_v56 = vpop.eup %2047  ;;  %1988 = vmatpush3.msra.mxu0 %v290_v55  ;;  %1989 = vmatprep.mubr.msk.f32.mxu0 %vm2062_vm1, %v2060_v20  ;;  %v1623_v20 = vpop.permute.xlu0 %1622 }
 0x430   :  { %v998_v57 = vmul.f32 %v2048_v56, %v2279_v31  ;;  %1997 = vmatprep.subr.mxu0 %v1627_v61 }
 0x432   :  { %1990 = vmatmul.mubr.msk.f32.vlgmr.msra.gmra.mxu0 %vm297_vm2, %v998_v57 }
 0x433   :  { %v2050_v58 = vpop.eup %2049  ;;  %1998 = vmatpush3.msra.mxu0 %v1627_v61  ;;  %v1752_v61 = vsub.s32 4, %v2099_v4 }
 0x434   :  { %v999_v59 = vmul.f32 %v2050_v58, %v2283_v33  ;;  %1999 = vmatprep.subr.mxu0 %v1625_v11 }
 0x435   :  { %2000 = vmatpush3.msra.mxu0 %v1625_v11 }
 0x436   :  { %1995 = vmatmul.mubr.msk.f32.vlgmr.msra.gmra.mxu1 %vm297_vm2, %v999_v59  ;;  %2001 = vmatprep.subr.mxu0 %v1623_v20 }
 0x437   :  { %2002 = vmatpush3.msra.mxu0 %v1623_v20 }
 0x48e   :  { %v1069_v62 = vpop.f32.mrf.mxu0 }
 0x490   :  { %v1961_v0 = vpop.f32.mrf.mxu0 }
 0x491   :  { %v1753_v0 = vrot.slane %v2115_v7, %v1752_v61 }
 0x492   :  { %v1142_v8 = vpop.f32.mrf.mxu1 }
 0x494   :  { %v1966_v10 = vpop.f32.mrf.mxu1 }
 0x4e2   :  { %v1288_v12 = vpop.f32.mrf.mxu1 }
 0x4e3   :  { %1588 = vrot.lane.b32.xlu1 %v1288_v12, %s2063_s1 }
 0x4e4   :  { %v1976_v13 = vpop.f32.mrf.mxu1 }
 0x4e6   :  { %v1434_v14 = vpop.f32.mrf.mxu1 }
 0x4e8   :  { %v1986_v15 = vpop.f32.mrf.mxu1 }
 0x4ea   :  { %v1215_v16 = vpop.f32.mrf.mxu0 }
 0x4eb   :  { %1586 = vrot.lane.b32.xlu1 %v1215_v16, %s2063_s1 }
 0x4ec   :  { %v1971_v17 = vpop.f32.mrf.mxu0 }
 0x4ee   :  { %v1361_v18 = vpop.f32.mrf.mxu0 }
 0x4ef   :  { %1596 = vrot.lane.b32.xlu1 %v1434_v14, %s2064_s17  ;;  %1594 = vrot.lane.b32.xlu0 %v1361_v18, %s2064_s17 }
 0x4f0   :  { %v1981_v21 = vpop.f32.mrf.mxu0 }
 0x4f2   :  { %v1507_v19 = vpop.f32.mrf.mxu0 }
 0x4f3   :  { %1602 = vrot.lane.b32.xlu0 %v1507_v19, %s2065_s18  ;;  %1620 = vrot.lane.b32.xlu1 %v2125_v9, %s2056_s23 }
 0x4f4   :  { %v1991_v22 = vpop.f32.mrf.mxu0 }
 0x4f6   :  { %v1580_v23 = vpop.f32.mrf.mxu1 }
 0x4f7   :  { %1604 = vrot.lane.b32.xlu0 %v1580_v23, %s2065_s18  ;;  %1713 = vrot.lane.b32.xlu1 %v2084_v1, %s2061_s27 }
 0x4f8   :  { %v1996_v24 = vpop.f32.mrf.mxu1 }
 0x4fb   :  { %1715 = vrot.lane.b32.xlu0 %v2104_v5, %s2061_s27 }
 0x555   :  { %v1589_v25 = vpop.permute.xlu1 %1588 }
 0x556   :  { %v1609_v33 = vsel %vm297_vm2, %v1142_v8, %v1589_v25 }
 0x55d   :  { %v1587_v26 = vpop.permute.xlu1 %1586 }
 0x55e   :  { %v1608_v29 = vsel %vm297_vm2, %v1069_v62, %v1587_v26  ;;  %v1758_v62 = vsub.s32 5, %v2099_v4 }
 0x560   :  { %v1759_v11 = vrot.slane %v2115_v7, %v1758_v62 }
 0x561   :  { %v1597_v27 = vpop.permute.xlu1 %1596  ;;  %v1595_v28 = vpop.permute.xlu0 %1594 }
 0x562   :  { %v1611_v30 = vsel %vm1610_vm3, %v1608_v29, %v1595_v28  ;;  %v1612_v34 = vsel %vm1610_vm3, %v1609_v33, %v1597_v27 }
 0x565   :  { %v1603_v9 = vpop.permute.xlu0 %1602  ;;  %v1621_v31 = vpop.permute.xlu1 %1620 }
 0x566   :  { %v1614_v32 = vsel %vm1613_vm4, %v1611_v30, %v1603_v9  ;;  %2003 = vmatprep.subr.mxu0 %v1621_v31 }
 0x567   :  { %2005 = vmatprep.mubr.msk.f32.mxu0 %vm36_vm0, %v1614_v32  ;;  %2004 = vmatpush3.msra.mxu0 %v1621_v31 }
 0x569   :  { %v1605_v35 = vpop.permute.xlu0 %1604  ;;  %v1714_v60 = vpop.permute.xlu1 %1713 }
 0x56a   :  { %v1615_v36 = vsel %vm1613_vm4, %v1612_v34, %v1605_v35 }
 0x56b   :  { %2006 = vmatmul.mubr.msk.f32.vlgmr.msra.gmra.mxu0 %vm36_vm0, %v1615_v36 }
 0x56d   :  { %v1716_v40 = vpop.permute.xlu0 %1715 }
 0x62b   :  { %v2007_v39 = vpop.f32.mrf.mxu0 }
 0x62c   :  { %v1710_v63 = vadd.f32 %v2007_v39, %v1619_v38 }
 0x62d   :  { %v1704_v41 = vpop.f32.mrf.mxu0 }
 0x62e   :  { %v1720_v2 = vadd.f32 %v1716_v40, %v1710_v63  ;;  %v1705_v3 = vadd.f32 %v1704_v41, %v1619_v38 }
 0x630   :  { %v1719_v6 = vadd.f32 %v1714_v60, %v1705_v3  ;;  %v1722_v42 = vadd.f32 %v1720_v2, %v2104_v5 }
 0x632   :  { %v1726_v43 = vsel %vm36_vm0, %v1722_v42, 0.0  ;;  %v1721_v44 = vadd.f32 %v1719_v6, %v2084_v1 }
 0x633   :  { %1727 = vadd.xlane.f32.xlu0 %v1726_v43 }
 0x634   :  { %v1723_v45 = vsel %vm36_vm0, %v1721_v44, 0.0 }
 0x635   :  { %1724 = vadd.xlane.f32.xlu1 %v1723_v45 }
 0x6bc   :  { %v1728_v46 = vpop.xlane.xlu0 %1727 }
 0x6bd   :  { %v1731_v47 = vmul.f32 0.03125, %v1728_v46 }
 0x6be   :  { %v1725_v48 = vpop.xlane.xlu1 %1724 }
 0x6bf   :  { %v1733_v49 = vsub.f32 %v1722_v42, %v1731_v47  ;;  %v1730_v50 = vmul.f32 0.03125, %v1725_v48 }
 0x6c1   :  { %v1732_v51 = vsub.f32 %v1721_v44, %v1730_v50  ;;  %v1735_v52 = vmul.f32 %v1733_v49, %v1733_v49 }
 0x6c3   :  { %v1739_v53 = vsel %vm36_vm0, %v1735_v52, 0.0  ;;  %v1734_v54 = vmul.f32 %v1732_v51, %v1732_v51 }
 0x6c4   :  { %1740 = vadd.xlane.f32.xlu1 %v1739_v53 }
 0x6c5   :  { %v1736_v5 = vsel %vm36_vm0, %v1734_v54, 0.0 }
 0x6c6   :  { %1737 = vadd.xlane.f32.xlu0 %v1736_v5 }
 0x74d   :  { %v1741_v55 = vpop.xlane.xlu1 %1740 }
 0x74e   :  { %v1743_v1 = vmul.f32 0.03125, %v1741_v55 }
 0x74f   :  { %v1738_v56 = vpop.xlane.xlu0 %1737 }
 0x750   :  { %v1745_v57 = vadd.f32 1e-05, %v1743_v1  ;;  %v1742_v58 = vmul.f32 0.03125, %v1738_v56 }
 0x752   :  { %2051 = vrsqrt.f32 %v1745_v57  ;;  %v1744_v59 = vadd.f32 1e-05, %v1742_v58 }
 0x754   :  { %2053 = vrsqrt.f32 %v1744_v59 }
 0x75f   :  { %v2052_v8 = vpop.eup %2051 }
 0x760   :  { %v1749_v10 = vmul.f32 %v2052_v8, %v1733_v49 }
 0x761   :  { %v2054_v20 = vpop.eup %2053 }
 0x762   :  { %v1748_v12 = vmul.f32 %v2054_v20, %v1732_v51  ;;  %v1755_v13 = vmul.f32 %v1753_v0, %v1749_v10 }
 0x764   :  { %v1761_v14 = vadd.f32 %v1759_v11, %v1755_v13  ;;  %v1754_v15 = vmul.f32 %v1753_v0, %v1748_v12 }
 0x766   :  { %v1781_v16 = vrot.slane %v1761_v14, 1  ;;  %v1760_v17 = vadd.f32 %v1759_v11, %v1754_v15  ;;  %v1785_v19 = vrot.slane %v1761_v14, 2  ;;  %v1789_v7 = vrot.slane %v1761_v14, 3 }
 0x768   :  { %1782 = vrot.lane.b32.xlu1 %v1781_v16, %s2056_s23  ;;  %v1763_v18 = vrot.slane %v1760_v17, 1  ;;  %v1767_v21 = vrot.slane %v1760_v17, 2  ;;  %v1771_v4 = vrot.slane %v1760_v17, 3 }
 0x76a   :  { %1764 = vrot.lane.b32.xlu0 %v1763_v18, %s2056_s23 }
 0x76c   :  { %1768 = vrot.lane.b32.xlu1 %v1767_v21, %s2061_s27 }
 0x76e   :  { %1772 = vrot.lane.b32.xlu0 %v1771_v4, %s2055_s13 }
 0x770   :  { %1786 = vrot.lane.b32.xlu1 %v1785_v19, %s2061_s27 }
 0x772   :  { %1790 = vrot.lane.b32.xlu0 %v1789_v7, %s2055_s13 }
 0x7da   :  { %v1783_v22 = vpop.permute.xlu1 %1782 }
 0x7db   :  { %v1793_v29 = vsel %vm36_vm0, %v1761_v14, %v1783_v22 }
 0x7dc   :  { %v1765_v23 = vpop.permute.xlu0 %1764 }
 0x7dd   :  { %v1775_v24 = vsel %vm36_vm0, %v1760_v17, %v1765_v23 }
 0x7de   :  { %v1769_v25 = vpop.permute.xlu1 %1768 }
 0x7df   :  { %v1777_v26 = vsel %vm1776_vm5, %v1775_v24, %v1769_v25 }
 0x7e0   :  { %v1773_v27 = vpop.permute.xlu0 %1772 }
 0x7e1   :  { %v1779_v28 = vsel %vm1778_vm6, %v1777_v26, %v1773_v27 }
 0x7e2   :  { %v1787_v30 = vpop.permute.xlu1 %1786  ;;  %v1797_v9 = vrot.slane %v1779_v28, 3 }
 0x7e3   :  { %v1794_v31 = vsel %vm1776_vm5, %v1793_v29, %v1787_v30 }
 0x7e4   :  { %v1791_v32 = vpop.permute.xlu0 %1790  ;;  %v1805_v36 = vsel %vm1804_vm7, %v1779_v28, %v1797_v9 }
 0x7e5   :  { %v1795_v33 = vsel %vm1778_vm6, %v1794_v31, %v1791_v32 }
 0x7e6   :  { %v1800_v34 = vrot.slane %v1795_v33, 6  ;;  %v1802_v35 = vrot.slane %v1795_v33, 1 }
 0x7e8   :  { %v1807_v37 = vsel %vm1806_vm8, %v1805_v36, %v1800_v34 }
 0x7e9   :  { %v1809_v38 = vsel %vm1808_vm9, %v1807_v37, %v1802_v35 }
 0x7ea   :  { %1810 = vst [vmem:[%s2360_s2] sm:$0xf] %v1809_v38 }

</bundles_post_ra>
